<compile_context>
chip_gen: v5e
topology: v5e:2x2
jax: 0.10.0
libtpu: 0.0.40
codegen_flags: <defaults>
</compile_context>

<pallas_src>
import functools

import jax
import jax.numpy as jnp
from jax.experimental import pallas as pl
from jax.experimental.pallas import tpu as pltpu


def _round_up(n, m):
    return ((n + m - 1) // m) * m


def _sage_fused_kernel(x_ref, e_ref, s_ref, ws_ref, wn_ref, b_ref, out_ref):
    """One grid step == one SAGEConv('mean') layer; h carried in the resident out block.

    x_ref   : [N_pad, D_pad]      bf16  padded input features (consumed at layer 0 only)
    e_ref   : [1, N_pad, N_pad]   bf16  0/1 edge matrix of this layer (exact in bf16)
    s_ref   : [1, N_pad, 1]       f32   per-dst-row 1/deg scale ('mean' aggregation)
    ws_ref  : [1, D_pad, D_pad]   bf16  W_self
    wn_ref  : [1, D_pad, D_pad]   bf16  W_neigh
    b_ref   : [1, 1, D_pad]       f32   bias
    out_ref : [N_pad, D_pad]      f32   VMEM-resident carry / final output
    """
    layer = pl.program_id(0)

    @pl.when(layer == 0)
    def _():
        out_ref[...] = x_ref[...].astype(jnp.float32)

    h = out_ref[...]                                   # f32 carry (prev layer / x)
    h_bf = h.astype(jnp.bfloat16)                      # bf16 operands for the MXU

    # Mean aggregation, factored: exact 0/1 edge matmul (f32 acc) then f32 1/deg scale.
    nsum = jnp.dot(e_ref[0], h_bf, preferred_element_type=jnp.float32)
    h_neigh = nsum * s_ref[0]                          # [N,D] * [N,1] broadcast

    # Two MXU dots accumulated in f32 (no concat staging buffer).
    hz = (
        jnp.dot(h_bf, ws_ref[0], preferred_element_type=jnp.float32)
        + jnp.dot(h_neigh.astype(jnp.bfloat16), wn_ref[0],
                  preferred_element_type=jnp.float32)
        + b_ref[0]
    )

    # Epilogue in f32: relu, then F.normalize(p=2, dim=-1) == x / max(||x||, 1e-12).
    hz = jnp.maximum(hz, 0.0)
    sumsq = jnp.sum(hz * hz, axis=-1, keepdims=True)
    # rsqrt(max(ss, 1e-24)) == 1 / max(sqrt(ss), 1e-12): one exact EUP op.
    out_ref[...] = hz * jax.lax.rsqrt(jnp.maximum(sumsq, 1e-24))


def pack_sage_inputs(blocks, x, params, h_dim):
    """Pad & stack graph blocks + weights ONCE (hoisted out of the per-call jitted path).

    blocks : list of (edges[n_dst, n_src] in {0,1}, inv_deg[n_dst, 1]) per layer
    params : list of (w_neigh[in,h], w_self[in,h], bias[h]) per layer
    """
    n_layers = len(blocks)
    in_dim = x.shape[1]
    assert in_dim == h_dim, "module constructs every layer as SAGEConv(in_dim, h_dim)"

    # DGL-block invariant required by the "self features = carried h" shortcut:
    # dst nodes are the prefix of src nodes, and each layer's src = previous dst/x.
    assert blocks[0][0].shape[1] == x.shape[0]
    for l in range(1, n_layers):
        assert blocks[l][0].shape[1] == blocks[l - 1][0].shape[0]
    for edges, _ in blocks:
        assert edges.shape[0] <= edges.shape[1]

    all_counts = [e.shape[0] for e, _ in blocks] + [e.shape[1] for e, _ in blocks]
    # Lane-dense adjacency: pad node count to a multiple of 128 (covers bf16 sublanes too).
    n_pad = _round_up(max(all_counts), 128)
    d_pad = _round_up(max(in_dim, h_dim), 128)

    x_pad = jnp.zeros((n_pad, d_pad), jnp.float32).at[: x.shape[0], :in_dim].set(x)
    x_pad = x_pad.astype(jnp.bfloat16)          # only feeds the MXU; halve its DMA bytes

    e_stack = jnp.zeros((n_layers, n_pad, n_pad), jnp.float32)
    s_stack = jnp.zeros((n_layers, n_pad, 1), jnp.float32)
    ws_stack = jnp.zeros((n_layers, d_pad, d_pad), jnp.float32)
    wn_stack = jnp.zeros((n_layers, d_pad, d_pad), jnp.float32)
    b_stack = jnp.zeros((n_layers, 1, d_pad), jnp.float32)
    for l, ((edges, inv_deg), (w_neigh, w_self, bias)) in enumerate(zip(blocks, params)):
        nd, ns = edges.shape
        e_stack = e_stack.at[l, :nd, :ns].set(edges)
        s_stack = s_stack.at[l, :nd, :].set(inv_deg)
        ws_stack = ws_stack.at[l, :in_dim, :h_dim].set(w_self)
        wn_stack = wn_stack.at[l, :in_dim, :h_dim].set(w_neigh)
        b_stack = b_stack.at[l, 0, :h_dim].set(bias)

    # 0/1 edges are exact in bf16; 1/deg stays f32 (applied in the f32 epilogue).
    e_stack = e_stack.astype(jnp.bfloat16)
    ws_stack = ws_stack.astype(jnp.bfloat16)
    wn_stack = wn_stack.astype(jnp.bfloat16)
    return x_pad, e_stack, s_stack, ws_stack, wn_stack, b_stack


@functools.partial(jax.jit, static_argnums=(6, 7))
def sage_forward_packed(x_pad, e_stack, s_stack, ws_stack, wn_stack, b_stack,
                        n_dst_final, h_dim):
    """All SAGE layers fused into one pallas_call, grid=(n_layers,)."""
    n_layers, n_pad, _ = e_stack.shape
    d_pad = x_pad.shape[1]

    # VMEM budget: double-buffered input blocks + (conservatively double) f32 carry.
    bytes_in = (
        n_pad * d_pad * 2            # x bf16
        + n_pad * n_pad * 2          # edges bf16
        + n_pad * 4                  # 1/deg f32
        + 2 * d_pad * d_pad * 2      # W_self + W_neigh bf16
        + d_pad * 4                  # bias f32
    )
    bytes_out = n_pad * d_pad * 4
    vmem_limit = int(min(max(2 * bytes_in + 2 * bytes_out + (4 << 20), 16 << 20),
                         48 << 20))

    out_pad = pl.pallas_call(
        _sage_fused_kernel,
        out_shape=jax.ShapeDtypeStruct((n_pad, d_pad), jnp.float32),
        grid_spec=pltpu.PrefetchScalarGridSpec(
            num_scalar_prefetch=0,
            grid=(n_layers,),
            in_specs=[
                pl.BlockSpec((n_pad, d_pad), lambda l: (0, 0)),           # x (layer 0)
                pl.BlockSpec((1, n_pad, n_pad), lambda l: (l, 0, 0)),     # edges[l]
                pl.BlockSpec((1, n_pad, 1), lambda l: (l, 0, 0)),         # 1/deg[l]
                pl.BlockSpec((1, d_pad, d_pad), lambda l: (l, 0, 0)),     # W_self[l]
                pl.BlockSpec((1, d_pad, d_pad), lambda l: (l, 0, 0)),     # W_neigh[l]
                pl.BlockSpec((1, 1, d_pad), lambda l: (l, 0, 0)),         # bias[l]
            ],
            out_specs=pl.BlockSpec((n_pad, d_pad), lambda l: (0, 0)),     # resident carry
        ),
        # The single grid axis is a sequential layer carry -> "arbitrary".
        compiler_params=pltpu.CompilerParams(
            dimension_semantics=("arbitrary",),
            vmem_limit_bytes=vmem_limit,
        ),
    )(x_pad, e_stack, s_stack, ws_stack, wn_stack, b_stack)

    return out_pad[:n_dst_final, :h_dim]


def sage_forward(blocks, x, params, n_dst_final, h_dim):
    """Equivalent of SAGE.forward(blocks, x)."""
    packed = pack_sage_inputs(blocks, x, params, h_dim)
    return sage_forward_packed(*packed, n_dst_final, h_dim)


def sage_forward_ref(blocks, x, params):
    """Pure-JAX f32 reference of the same semantics (for a sanity check)."""
    h = x
    for (edges, inv_deg), (w_neigh, w_self, bias) in zip(blocks, params):
        n_dst = edges.shape[0]
        h_neigh = (edges * inv_deg) @ h
        z = h[:n_dst] @ w_self + h_neigh @ w_neigh + bias
        z = jnp.maximum(z, 0.0)
        l2 = jnp.sqrt(jnp.sum(z * z, axis=-1, keepdims=True))
        h = z / jnp.maximum(l2, 1e-12)
    return h


def _make_block(key, n_dst, n_src):
    """Dense random bipartite block: 0/1 edges + per-dst-row 1/deg ('mean' aggregation)."""
    edges = (jax.random.uniform(key, (n_dst, n_src)) < 0.5).astype(jnp.float32)
    deg = jnp.sum(edges, axis=1, keepdims=True)
    inv_deg = jnp.where(deg > 0, 1.0 / jnp.maximum(deg, 1.0), 0.0)
    return edges, inv_deg


def _init_params(key, n_layers, in_dim, h_dim):
    params = []
    for _ in range(n_layers):
        k1, k2, key = jax.random.split(key, 3)
        # Module bug-for-bug: every layer is SAGEConv(in_dim, h_dim, ...)
        w_neigh = (jax.random.normal(k1, (in_dim, h_dim)) * 0.1).astype(jnp.float32)
        w_self = (jax.random.normal(k2, (in_dim, h_dim)) * 0.1).astype(jnp.float32)
        bias = jnp.zeros((h_dim,), jnp.float32)
        params.append((w_neigh, w_self, bias))
    return params


if __name__ == "__main__":
    key = jax.random.PRNGKey(0)

    n_layers = 3
    in_dim = 32
    h_dim = 32  # must equal in_dim given the module's layer construction

    # Node counts per hop: 16 src -> 12 -> 10 -> 8 dst (final output nodes).
    node_counts = [16, 12, 10, 8]

    k_x, k_p, key = jax.random.split(key, 3)
    x = jax.random.normal(k_x, (node_counts[0], in_dim), dtype=jnp.float32)

    blocks = []
    for l in range(n_layers):
        key, k_adj = jax.random.split(key)
        blocks.append(_make_block(k_adj, node_counts[l + 1], node_counts[l]))

    params = _init_params(k_p, n_layers, in_dim, h_dim)

    out = sage_forward(blocks, x, params, node_counts[-1], h_dim)
    jax.block_until_ready(out)

    assert out.shape == (node_counts[-1], h_dim)
    assert out.dtype == jnp.float32
    assert bool(jnp.all(jnp.isfinite(out)))

    # Sanity check against the f32 reference. Kernel uses bf16 MXU operands for
    # features/weights (edges exact, 1/deg and epilogue in f32, exact rsqrt).
    ref = sage_forward_ref(blocks, x, params)
    max_err = float(jnp.max(jnp.abs(out - ref)))
    assert max_err < 5e-2, f"max abs error vs reference: {max_err}"

    print("KERNEL_OK")
</pallas_src>

<mosaic_0001>
module attributes {stable_mosaic.version = 11 : i64} {
  func.func @_sage_fused_kernel(%arg0: i32, %arg1: memref<128x128xbf16, #tpu.memory_space<vmem>>, %arg2: memref<1x128x128xbf16, #tpu.memory_space<vmem>>, %arg3: memref<1x128x1xf32, #tpu.memory_space<vmem>>, %arg4: memref<1x128x128xbf16, #tpu.memory_space<vmem>>, %arg5: memref<1x128x128xbf16, #tpu.memory_space<vmem>>, %arg6: memref<1x1x128xf32, #tpu.memory_space<vmem>>, %arg7: memref<128x128xf32, #tpu.memory_space<vmem>>) attributes {dimension_semantics = [#tpu.dimension_semantics<arbitrary>], iteration_bounds = array<i64: 3>, scalar_prefetch = 0 : i64, scratch_operands = 0 : i64, tpu.core_type = #tpu.core_type<tc>, window_params = [{pipeline_mode = #tpu.pipeline_mode<synchronous>, transform_indices = @transform_0, window_bounds = array<i64: 128, 128>}, {transform_indices = @transform_1, window_bounds = array<i64: 1, 128, 128>}, {transform_indices = @transform_2, window_bounds = array<i64: 1, 128, 1>}, {transform_indices = @transform_3, window_bounds = array<i64: 1, 128, 128>}, {transform_indices = @transform_4, window_bounds = array<i64: 1, 128, 128>}, {transform_indices = @transform_5, window_bounds = array<i64: 1, 1, 128>}, {pipeline_mode = #tpu.pipeline_mode<synchronous>, transform_indices = @transform_6, window_bounds = array<i64: 128, 128>}]} {
    %c0_i32 = arith.constant 0 : i32
    %0 = arith.cmpi eq, %arg0, %c0_i32 : i32
    %1 = arith.extui %0 : i1 to i32
    %c0_i32_0 = arith.constant 0 : i32
    %2 = arith.cmpi ne, %1, %c0_i32_0 : i32
    scf.if %2 {
      %c0_24 = arith.constant 0 : index
      %c0_25 = arith.constant 0 : index
      %35 = vector.load %arg1[%c0_24, %c0_25] : memref<128x128xbf16, #tpu.memory_space<vmem>>, vector<128x128xbf16>
      %36 = arith.extf %35 : vector<128x128xbf16> to vector<128x128xf32>
      %c0_26 = arith.constant 0 : index
      %c0_27 = arith.constant 0 : index
      %37 = vector.load %arg7[%c0_26, %c0_27] : memref<128x128xf32, #tpu.memory_space<vmem>>, vector<128x128xf32>
      tpu.vector_store %arg7[%c0_26, %c0_27], %36 {strides = array<i32>} : memref<128x128xf32, #tpu.memory_space<vmem>>, vector<128x128xf32>,
    } else {
    }
    %c0 = arith.constant 0 : index
    %c0_1 = arith.constant 0 : index
    %3 = vector.load %arg7[%c0, %c0_1] : memref<128x128xf32, #tpu.memory_space<vmem>>, vector<128x128xf32>
    %4 = arith.truncf %3 : vector<128x128xf32> to vector<128x128xbf16>
    %c0_2 = arith.constant 0 : index
    %c0_3 = arith.constant 0 : index
    %c0_4 = arith.constant 0 : index
    %5 = vector.load %arg2[%c0_2, %c0_3, %c0_4] : memref<1x128x128xbf16, #tpu.memory_space<vmem>>, vector<1x128x128xbf16>
    %6 = vector.shape_cast %5 : vector<1x128x128xbf16> to vector<128x128xbf16>
    %cst = arith.constant dense<0.000000e+00> : vector<128x128xf32>
    %7 = tpu.matmul %6, %4, %cst {dimension_numbers = #tpu.dot_dimension_numbers<[1], [0], [0], [1], [0, 0, 1, 1], [], []>} : vector<128x128xbf16>, vector<128x128xbf16>, vector<128x128xf32> -> vector<128x128xf32>
    %c0_5 = arith.constant 0 : index
    %c0_6 = arith.constant 0 : index
    %c0_7 = arith.constant 0 : index
    %8 = vector.load %arg3[%c0_5, %c0_6, %c0_7] : memref<1x128x1xf32, #tpu.memory_space<vmem>>, vector<1x128x1xf32>
    %9 = vector.shape_cast %8 : vector<1x128x1xf32> to vector<128x1xf32>
    %10 = vector.broadcast %9 : vector<128x1xf32> to vector<128x128xf32>
    %11 = arith.mulf %7, %10 : vector<128x128xf32>
    %c0_8 = arith.constant 0 : index
    %c0_9 = arith.constant 0 : index
    %c0_10 = arith.constant 0 : index
    %12 = vector.load %arg4[%c0_8, %c0_9, %c0_10] : memref<1x128x128xbf16, #tpu.memory_space<vmem>>, vector<1x128x128xbf16>
    %13 = vector.shape_cast %12 : vector<1x128x128xbf16> to vector<128x128xbf16>
    %cst_11 = arith.constant dense<0.000000e+00> : vector<128x128xf32>
    %14 = tpu.matmul %4, %13, %cst_11 {dimension_numbers = #tpu.dot_dimension_numbers<[1], [0], [0], [1], [0, 0, 1, 1], [], []>} : vector<128x128xbf16>, vector<128x128xbf16>, vector<128x128xf32> -> vector<128x128xf32>
    %15 = arith.truncf %11 : vector<128x128xf32> to vector<128x128xbf16>
    %c0_12 = arith.constant 0 : index
    %c0_13 = arith.constant 0 : index
    %c0_14 = arith.constant 0 : index
    %16 = vector.load %arg5[%c0_12, %c0_13, %c0_14] : memref<1x128x128xbf16, #tpu.memory_space<vmem>>, vector<1x128x128xbf16>
    %17 = vector.shape_cast %16 : vector<1x128x128xbf16> to vector<128x128xbf16>
    %cst_15 = arith.constant dense<0.000000e+00> : vector<128x128xf32>
    %18 = tpu.matmul %15, %17, %cst_15 {dimension_numbers = #tpu.dot_dimension_numbers<[1], [0], [0], [1], [0, 0, 1, 1], [], []>} : vector<128x128xbf16>, vector<128x128xbf16>, vector<128x128xf32> -> vector<128x128xf32>
    %19 = arith.addf %14, %18 : vector<128x128xf32>
    %c0_16 = arith.constant 0 : index
    %c0_17 = arith.constant 0 : index
    %c0_18 = arith.constant 0 : index
    %20 = vector.load %arg6[%c0_16, %c0_17, %c0_18] : memref<1x1x128xf32, #tpu.memory_space<vmem>>, vector<1x1x128xf32>
    %21 = vector.shape_cast %20 : vector<1x1x128xf32> to vector<1x128xf32>
    %22 = vector.broadcast %21 : vector<1x128xf32> to vector<128x128xf32>
    %23 = arith.addf %19, %22 : vector<128x128xf32>
    %cst_19 = arith.constant 0.000000e+00 : f32
    %24 = vector.broadcast %cst_19 : f32 to vector<128x128xf32>
    %25 = arith.maximumf %23, %24 : vector<128x128xf32>
    %26 = arith.mulf %25, %25 : vector<128x128xf32>
    %cst_20 = arith.constant dense<0.000000e+00> : vector<128xf32>
    %27 = vector.multi_reduction <add>, %26, %cst_20 [1] : vector<128x128xf32> to vector<128xf32>
    %28 = vector.shape_cast %27 : vector<128xf32> to vector<128x1xf32>
    %cst_21 = arith.constant 1.000000e-24 : f32
    %29 = vector.broadcast %cst_21 : f32 to vector<128x1xf32>
    %30 = arith.maximumf %28, %29 : vector<128x1xf32>
    %31 = math.rsqrt %30 : vector<128x1xf32>
    %32 = vector.broadcast %31 : vector<128x1xf32> to vector<128x128xf32>
    %33 = arith.mulf %25, %32 : vector<128x128xf32>
    %c0_22 = arith.constant 0 : index
    %c0_23 = arith.constant 0 : index
    %34 = vector.load %arg7[%c0_22, %c0_23] : memref<128x128xf32, #tpu.memory_space<vmem>>, vector<128x128xf32>
    tpu.vector_store %arg7[%c0_22, %c0_23], %33 {strides = array<i32>} : memref<128x128xf32, #tpu.memory_space<vmem>>, vector<128x128xf32>,
    return
  }
  func.func @transform_0(%arg0: i32) -> (i32, i32) {
    %c0_i32 = arith.constant 0 : i32
    %c0_i32_0 = arith.constant 0 : i32
    %c0_i32_1 = arith.constant 0 : i32
    return %c0_i32, %c0_i32_0 : i32, i32
  }
  func.func @transform_1(%arg0: i32) -> (i32, i32, i32) {
    %c0_i32 = arith.constant 0 : i32
    %c0_i32_0 = arith.constant 0 : i32
    %c0_i32_1 = arith.constant 0 : i32
    return %arg0, %c0_i32, %c0_i32_0 : i32, i32, i32
  }
  func.func @transform_2(%arg0: i32) -> (i32, i32, i32) {
    %c0_i32 = arith.constant 0 : i32
    %c0_i32_0 = arith.constant 0 : i32
    %c0_i32_1 = arith.constant 0 : i32
    return %arg0, %c0_i32, %c0_i32_0 : i32, i32, i32
  }
  func.func @transform_3(%arg0: i32) -> (i32, i32, i32) {
    %c0_i32 = arith.constant 0 : i32
    %c0_i32_0 = arith.constant 0 : i32
    %c0_i32_1 = arith.constant 0 : i32
    return %arg0, %c0_i32, %c0_i32_0 : i32, i32, i32
  }
  func.func @transform_4(%arg0: i32) -> (i32, i32, i32) {
    %c0_i32 = arith.constant 0 : i32
    %c0_i32_0 = arith.constant 0 : i32
    %c0_i32_1 = arith.constant 0 : i32
    return %arg0, %c0_i32, %c0_i32_0 : i32, i32, i32
  }
  func.func @transform_5(%arg0: i32) -> (i32, i32, i32) {
    %c0_i32 = arith.constant 0 : i32
    %c0_i32_0 = arith.constant 0 : i32
    %c0_i32_1 = arith.constant 0 : i32
    return %arg0, %c0_i32, %c0_i32_0 : i32, i32, i32
  }
  func.func @transform_6(%arg0: i32) -> (i32, i32) {
    %c0_i32 = arith.constant 0 : i32
    %c0_i32_0 = arith.constant 0 : i32
    %c0_i32_1 = arith.constant 0 : i32
    return %c0_i32, %c0_i32_0 : i32, i32
  }
}

</mosaic_0001>

<bundles_post_ra>
// kernel: sage_forward_packed.1
= control target key start
LH: loop header
LB: loop body
LE: loop exit
PB: predicated region body
PF: predicated region fallthrough
CT: control target
= control target key end

     0   :  { %11 = vsyncpa [#allocation3], 0  ;;  %s2174_s0 = inlined_call_operand.hbm [shape: bf16[128,128], index: 0, kind: input, shape index: {}]   ;;  %s2175_s1 = inlined_call_operand.vmem [shape: bf16[3,128,128], index: 1, kind: input, shape index: {}]   ;;  %s2176_s2 = inlined_call_operand.vmem [shape: f32[3,128,1], index: 2, kind: input, shape index: {}]   ;;  %s2177_s3 = inlined_call_operand.vmem [shape: bf16[3,128,128], index: 3, kind: input, shape index: {}]   ;;  %s2178_s4 = inlined_call_operand.hbm [shape: bf16[3,128,128], index: 4, kind: input, shape index: {}]   ;;  %s2179_s5 = inlined_call_operand.vmem [shape: f32[3,1,128], index: 5, kind: input, shape index: {}]   ;;  %s2180_s6 = inlined_call_operand.vmem [shape: f32[128,128], index: 6, kind: output, shape index: {}]  }
   0x1   :  { %12 = vsyncpa [#allocation5], 0 }
   0x2   :  { %14 = vsyncpa [#allocation5 + $0x1], 0  ;;  %s1707_s21 = smov 0   ;;  %s1709_s22 = smov 0  }
   0x3   :  { %s1711_s23 = smov 0   ;;  %s1713_s24 = smov 0  }
   0x4 LB: > { %s1726_s25 = sadd.s32 4294967295, %s1666_s24   ;;  %p139_p0 = scmp.ne.s32.totalorder %s1658_s22, %s1654_s21  ;;  %s1666_s24 = sphi %s1713_s24, %s2187_s24   ;;  %s1662_s23 = sphi %s1711_s23, %s2186_s23   ;;  %s1658_s22 = sphi %s1709_s22, %s2185_s22   ;;  %s1654_s21 = sphi %s1707_s21, %s2184_s21  }
   0x5   : > { %p140_p1 = scmp.eq.s32.totalorder %s1726_s25, 0  ;;  %p1274_p2 = scmp.ge.s32.totalorder %s1666_s24, 1 }
   0x6   : > { %p197_p3 = scmp.lt.s32.totalorder %s1666_s24, 4  ;;  %p1275_p4 = scmp.ne.s32.totalorder %s1726_s25, 0 }
   0x7   : > { %p1735_p5 = por %p140_p1, %p139_p0  ;;  %s208_s29 = sshll.u32 %s2174_s0, 4  ;;  %s209_s29 = int_to_ptr.hbm [resolvable:$true] %s208_s29 }
   0x8   : > { %p1742_p6 = pnand %p1274_p2, %p197_p3  ;;  %s1668_s7 = smov [#allocation2]  }
   0x9   : > { %s210_s8 = sshll.u32 %s1668_s7, 4  ;;  %s1751_s9 = sadd.s32 1, %s1666_s24   ;;  %s211_s8 = int_to_ptr.vmem [resolvable:$true] %s210_s8 }
   0xa   : > { %p1485_p7 = pneg %p1742_p6  ;;  %s1669_s10 = smov 64  }
   0xb   : > { %s1670_s11 = smov 4   ;;  %s123_s12 = ssub.s32 %s1666_s24, %s1751_s9 }
   0xc   : > { %p1486_p8 = pnand %p1485_p7, %p140_p1  ;;  %s126_s13 = sadd.s32 1, %s1662_s23 }
   0xd   : > { %p124_p9 = scmp.eq.s32.totalorder %s123_s12, 0  ;;  %p133_p10 = scmp.ne.s32.totalorder %s1662_s23, %s1658_s22 }
   0xe   : > { %1488 = dma.hbm_to_vmem [thread:$0]  (!%p1486_p8), %s209_s29, 1024, %s211_s8, [#allocation3], %s1669_s10, %s1669_s10, %s1670_s11  }
   0xf   : > { %p134_p11 = scmp.eq.s32.totalorder %s1666_s24, 0  ;;  %p1494_p12 = scmp.lt.s32.totalorder %s1666_s24, 3 }
  0x10   : > { %s1764_s14 = scalar_select %p124_p9, %s1662_s23, %s126_s13  }
  0x11   : > { %p135_p13 = por %p134_p11, %p133_p10  ;;  %s248_s15 = sand.u32 1, %s1662_s23  }
  0x12   : > { %s1277_s16 = sshll.u32 %s248_s15, 6  ;;  %s1388_s17 = sshll.u32 %s1666_s24, 6 }
  0x13   : > { %s257_s20 = scalar_lea.hbm %s2178_s4, %s1388_s17  ;;  %s252_s21 = scalar_lea.vmem [#allocation4], %s1277_s16 }
  0x14   : > { %s260_s27 = sshll.u32 %s252_s21, 4  ;;  %s258_s28 = sshll.u32 %s257_s20, 4  ;;  %s261_s27 = int_to_ptr.vmem [resolvable:$true] %s260_s27  ;;  %s259_s28 = int_to_ptr.hbm [resolvable:$true] %s258_s28 }
  0x15   : > { %p1771_p0 = pnand %p1494_p12, %p135_p13  ;;  %s249_s7 = scalar_lea.sflag [#allocation5], %s248_s15 }
  0x16   : > { %s1598_s8 = sshra.s32 %s259_s28, 4  ;;  %s1605_s16 = scalar_lea.hbm %s2178_s4, 192  ;;  %s1599_s8 = int_to_ptr.hbm [resolvable:$true] %s1598_s8 }
  0x17   : > { %s1600_s12 = scalar_lea.hbm %s1599_s8, 64  ;;  %p1602_p3 = pneg %p1771_p0 }
  0x18   : > { %p1601_p2 = scmp.ne.s32.totalorder %s1599_s8, %s1600_s12  ;;  %p1606_p9 = scmp.lt.s32.totalorder %s1599_s8, %s2178_s4 }
  0x19   : > { %p1607_p10 = scmp.lt.s32.totalorder %s1605_s16, %s1600_s12 }
  0x1a   : > { %p1603_p7 = pnand %p1602_p3, %p1601_p2 }
  0x1b   : > { %p1608_p11 = por %p1607_p10, %p1606_p9 }
  0x1c   : > { %p1604_p8 = pneg %p1603_p7 }
  0x1e   : > { %p1609_p12 = pnand %p1608_p11, %p1604_p8 }
  0x20   : > { %1612 = shalt.err (!%p1609_p12)
}
  0x21   : > { %1492 = dma.hbm_to_vmem [thread:$0]  (!%p1771_p0), %s259_s28, 1024, %s261_s27, %s249_s7, %s1669_s10, %s1669_s10, %s1670_s11  }
  0x22   : > { %278 = sbr.rel (%p1742_p6) target bundleno = 618 (0x26a), region = 44 }
  0x27   : > { %1645 = dma.done.wait (%p140_p1), [#allocation3], 1024  }
  0x28   : > { %1647 = vsyncadd (%p140_p1), [#allocation3], 4294966272  ;;  %s285_s15 = sand.u32 1, %s1658_s22  }
  0x29   : > { %s1282_s19 = sshll.u32 %s285_s15, 6  ;;  %s286_s20 = scalar_lea.sflag [#allocation5], %s285_s15 }
  0x2a   : > { %s1795_s21 = scalar_lea.vmem [#allocation4], %s1282_s19 }
  0x2b   : > { %1649 = dma.done.wait (%p1735_p5), %s286_s20, 1024  }
  0x2c   : > { %1651 = vsyncadd (%p1735_p5), %s286_s20, 4294966272  ;;  %p332_p6 = scmp.lt.s32.totalorder %s1726_s25, 2 }
  0x2e   : > { %s1803_s30 = scalar_select %p332_p6, %s1726_s25, 2 }
  0x2f   : > { %353 = sbr.rel (%p1275_p4) target bundleno = 71 (0x47), region = 56 }
  0x30   : > { %s1389_s10 = sshll.u32 %s1803_s30, 6  ;;  %s1390_s11 = sshll.u32 %s1803_s30, 7 }
  0x31   : > { %s1810_s29 = scalar_lea.vmem %s2175_s1, %s1389_s10  ;;  %s1815_s26 = scalar_lea.vmem %s2176_s2, %s1390_s11 }
  0x32   : > { %s1820_s13 = scalar_lea.vmem %s2177_s3, %s1389_s10  ;;  %s349_s18 = scalar_lea.vmem %s2179_s5, %s1803_s30 }
  0x34   : > { %v1417_v0 = vld [vmem:[#allocation2] sm:$0xff]   ;;  %v1448_v1 = vld [vmem:[#allocation2 + $0x8] sm:$0xff]   ;;  %v1449_v2 = vld [vmem:[#allocation2 + $0x10] sm:$0xff]  }
  0x35   : > { %v1418_v3 = vunpack.c.l.bf16 %v1417_v0  ;;  %v1419_v4 = vunpack.c.h.bf16 %v1417_v0  ;;  %v1422_v5 = vunpack.c.l.bf16 %v1448_v1  ;;  %v1423_v6 = vunpack.c.h.bf16 %v1448_v1  ;;  %v1450_v7 = vld [vmem:[#allocation2 + $0x18] sm:$0xff]   ;;  %v1451_v10 = vld [vmem:[#allocation2 + $0x20] sm:$0xff]   ;;  %v1452_v13 = vld [vmem:[#allocation2 + $0x28] sm:$0xff]  }
  0x36   : > { %v1426_v8 = vunpack.c.l.bf16 %v1449_v2  ;;  %v1427_v9 = vunpack.c.h.bf16 %v1449_v2  ;;  %v1430_v11 = vunpack.c.l.bf16 %v1450_v7  ;;  %v1431_v12 = vunpack.c.h.bf16 %v1450_v7  ;;  %v1453_v16 = vld [vmem:[#allocation2 + $0x30] sm:$0xff]   ;;  %v1454_v19 = vld [vmem:[#allocation2 + $0x38] sm:$0xff]  }
  0x37   : > { %386 = vst [vmem:[%s2180_s6] sm:$0xff] %v1418_v3  ;;  %v1434_v14 = vunpack.c.l.bf16 %v1451_v10  ;;  %v1435_v15 = vunpack.c.h.bf16 %v1451_v10  ;;  %v1438_v17 = vunpack.c.l.bf16 %v1452_v13  ;;  %v1439_v18 = vunpack.c.h.bf16 %v1452_v13 }
  0x38   : > { %387 = vst [vmem:[%s2180_s6 + $0x8] sm:$0xff] %v1419_v4  ;;  %v1442_v20 = vunpack.c.l.bf16 %v1453_v16  ;;  %v1443_v21 = vunpack.c.h.bf16 %v1453_v16  ;;  %v1446_v22 = vunpack.c.l.bf16 %v1454_v19  ;;  %v1447_v23 = vunpack.c.h.bf16 %v1454_v19 }
  0x39   : > { %388 = vst [vmem:[%s2180_s6 + $0x10] sm:$0xff] %v1422_v5 }
  0x3a   : > { %389 = vst [vmem:[%s2180_s6 + $0x18] sm:$0xff] %v1423_v6 }
  0x3b   : > { %390 = vst [vmem:[%s2180_s6 + $0x20] sm:$0xff] %v1426_v8 }
  0x3c   : > { %391 = vst [vmem:[%s2180_s6 + $0x28] sm:$0xff] %v1427_v9 }
  0x3d   : > { %392 = vst [vmem:[%s2180_s6 + $0x30] sm:$0xff] %v1430_v11 }
  0x3e   : > { %393 = vst [vmem:[%s2180_s6 + $0x38] sm:$0xff] %v1431_v12 }
  0x3f   : > { %394 = vst [vmem:[%s2180_s6 + $0x40] sm:$0xff] %v1434_v14 }
  0x40   : > { %395 = vst [vmem:[%s2180_s6 + $0x48] sm:$0xff] %v1435_v15 }
  0x41   : > { %396 = vst [vmem:[%s2180_s6 + $0x50] sm:$0xff] %v1438_v17 }
  0x42   : > { %397 = vst [vmem:[%s2180_s6 + $0x58] sm:$0xff] %v1439_v18 }
  0x43   : > { %398 = vst [vmem:[%s2180_s6 + $0x60] sm:$0xff] %v1442_v20 }
  0x44   : > { %399 = vst [vmem:[%s2180_s6 + $0x68] sm:$0xff] %v1443_v21 }
  0x45   : > { %400 = vst [vmem:[%s2180_s6 + $0x70] sm:$0xff] %v1446_v22 }
  0x46   : > { %401 = vst [vmem:[%s2180_s6 + $0x78] sm:$0xff] %v1447_v23 }
  0x47 PF: > { %v539_v26 = vld [vmem:[%s1815_s26] sm:$0xff]  ;;  %v1671_v28 = vmov 0   ;;  %v541_v34 = vld [vmem:[%s1815_s26 + $0x10] sm:$0xff]  ;;  %v540_v36 = vld [vmem:[%s1815_s26 + $0x8] sm:$0xff] }
  0x48   : > { %1532 = vset.pattern.permute.xlu0 %v1671_v28  ;;  %1533 = vset.pattern.permute.xlu1 %v1671_v28  ;;  %v412_v32 = vld [vmem:[%s2180_s6 + $0x50] sm:$0xff]  ;;  %v410_v37 = vld [vmem:[%s2180_s6 + $0x40] sm:$0xff]  ;;  %v411_v38 = vld [vmem:[%s2180_s6 + $0x48] sm:$0xff] }
  0x49   : > { %557 = vperm.xlu0 %1532, %v539_v26   ;;  %1534 = vset.pattern.permute.xlu2 %v1671_v28  ;;  %v413_v33 = vld [vmem:[%s2180_s6 + $0x58] sm:$0xff]  ;;  %v1915_v39 = vpack.c.bf16 %v411_v38, %v410_v37  ;;  %v408_v41 = vld [vmem:[%s2180_s6 + $0x30] sm:$0xff]  ;;  %v543_v44 = vld [vmem:[%s1815_s26 + $0x20] sm:$0xff] }
  0x4a   : > { %v414_v29 = vld [vmem:[%s2180_s6 + $0x60] sm:$0xff]  ;;  %567 = vperm.xlu1 %1533, %v541_v34   ;;  %v1904_v35 = vpack.c.bf16 %v413_v33, %v412_v32  ;;  %v542_v40 = vld [vmem:[%s1815_s26 + $0x18] sm:$0xff]  ;;  %v407_v46 = vld [vmem:[%s2180_s6 + $0x28] sm:$0xff] }
  0x4b   : > { %v415_v30 = vld [vmem:[%s2180_s6 + $0x68] sm:$0xff]  ;;  %v409_v42 = vld [vmem:[%s2180_s6 + $0x38] sm:$0xff]  ;;  %v406_v45 = vld [vmem:[%s2180_s6 + $0x20] sm:$0xff] }
  0x4c   : > { %v416_v24 = vld [vmem:[%s2180_s6 + $0x70] sm:$0xff]  ;;  %v1893_v31 = vpack.c.bf16 %v415_v30, %v414_v29  ;;  %v1926_v43 = vpack.c.bf16 %v409_v42, %v408_v41  ;;  %v1937_v47 = vpack.c.bf16 %v407_v46, %v406_v45  ;;  %v544_v48 = vld [vmem:[%s1815_s26 + $0x28] sm:$0xff]  ;;  %v405_v50 = vld [vmem:[%s2180_s6 + $0x18] sm:$0xff] }
  0x4d   : > { %v417_v25 = vld [vmem:[%s2180_s6 + $0x78] sm:$0xff]  ;;  %v404_v49 = vld [vmem:[%s2180_s6 + $0x10] sm:$0xff]  ;;  %v402_v53 = vld [vmem:[%s2180_s6] sm:$0xff] }
  0x4e   : > { %v1883_v27 = vpack.c.bf16 %v417_v25, %v416_v24  ;;  %v1948_v51 = vpack.c.bf16 %v405_v50, %v404_v49  ;;  %v554_v52 = vld [vmem:[%s1815_s26 + $0x78] sm:$0xff]  ;;  %v403_v54 = vld [vmem:[%s2180_s6 + $0x8] sm:$0xff]  ;;  %v545_v56 = vld [vmem:[%s1815_s26 + $0x30] sm:$0xff] }
  0x4f   : > { %v1959_v55 = vpack.c.bf16 %v403_v54, %v402_v53  ;;  %v1392_v57 = vld [vmem:[%s1810_s29] sm:$0xff]  ;;  %v1398_v58 = vld [vmem:[%s1810_s29 + $0x30] sm:$0xff]  ;;  %v548_v61 = vld [vmem:[%s1815_s26 + $0x48] sm:$0xff] }
  0x50   : > { %490 = vmatpush.bf16.msra.mxu0 %v1883_v27  ;;  %1455 = vmatpush.bf16.msra.mxu3 %v1883_v27  ;;  %v547_v59 = vld [vmem:[%s1815_s26 + $0x40] sm:$0xff]  ;;  %v550_v62 = vld [vmem:[%s1815_s26 + $0x58] sm:$0xff]  ;;  %v552_v63 = vld [vmem:[%s1815_s26 + $0x68] sm:$0xff] }
  0x51   : > { %562 = vperm.xlu0 %1532, %v540_v36   ;;  %v551_v60 = vld [vmem:[%s1815_s26 + $0x60] sm:$0xff]  ;;  %v1393_v0 = vld [vmem:[%s1810_s29 + $0x8] sm:$0xff]  ;;  %v1399_v1 = vld [vmem:[%s1810_s29 + $0x38] sm:$0xff] }
  0x52   : > { %572 = vperm.xlu1 %1533, %v542_v40   ;;  %617 = vperm.xlu2 %1534, %v551_v60   ;;  %v553_v2 = vld [vmem:[%s1815_s26 + $0x70] sm:$0xff]  ;;  %v546_v3 = vld [vmem:[%s1815_s26 + $0x38] sm:$0xff]  ;;  %v1396_v9 = vld [vmem:[%s1810_s29 + $0x20] sm:$0xff] }
  0x53   : > { %v1394_v4 = vld [vmem:[%s1810_s29 + $0x10] sm:$0xff]  ;;  %v1395_v6 = vld [vmem:[%s1810_s29 + $0x18] sm:$0xff]  ;;  %v1405_v10 = vld [vmem:[%s1820_s13 + $0x28] sm:$0xff] }
  0x54   : > { %491 = vmatpush.bf16.msra.mxu0 %v1893_v31  ;;  %1456 = vmatpush.bf16.msra.mxu3 %v1893_v31  ;;  %v549_v5 = vld [vmem:[%s1815_s26 + $0x50] sm:$0xff]  ;;  %v1407_v7 = vld [vmem:[%s1820_s13 + $0x38] sm:$0xff]  ;;  %v1404_v11 = vld [vmem:[%s1820_s13 + $0x20] sm:$0xff] }
  0x55   : > { %836 = vmatpush.bf16.msra.mxu2 %v1407_v7  ;;  %v1406_v8 = vld [vmem:[%s1820_s13 + $0x30] sm:$0xff]  ;;  %v1415_v12 = vld [vmem:[%s1795_s21 + $0x38] sm:$0xff]  ;;  %v1397_v16 = vld [vmem:[%s1810_s29 + $0x28] sm:$0xff] }
  0x56   : > { %739 = vmatpush.bf16.msra.mxu1 %v1415_v12  ;;  %v1403_v13 = vld [vmem:[%s1820_s13 + $0x18] sm:$0xff]  ;;  %v1414_v14 = vld [vmem:[%s1795_s21 + $0x30] sm:$0xff]  ;;  %v1413_v17 = vld [vmem:[%s1795_s21 + $0x28] sm:$0xff] }
  0x57   : > { %v1402_v15 = vld [vmem:[%s1820_s13 + $0x10] sm:$0xff]  ;;  %v1401_v18 = vld [vmem:[%s1820_s13 + $0x8] sm:$0xff]  ;;  %v1412_v19 = vld [vmem:[%s1795_s21 + $0x20] sm:$0xff] }
  0x58   : > { %492 = vmatpush.bf16.msra.mxu0 %v1904_v35  ;;  %1457 = vmatpush.bf16.msra.mxu3 %v1904_v35  ;;  %v1400_v20 = vld [vmem:[%s1820_s13] sm:$0xff]  ;;  %v1411_v21 = vld [vmem:[%s1795_s21 + $0x18] sm:$0xff]  ;;  %v1410_v22 = vld [vmem:[%s1795_s21 + $0x10] sm:$0xff] }
  0x59   : > { %577 = vperm.xlu0 %1532, %v543_v44   ;;  %837 = vmatpush.bf16.msra.mxu2 %v1406_v8  ;;  %v1409_v23 = vld [vmem:[%s1795_s21 + $0x8] sm:$0xff]  ;;  %v1408_v24 = vld [vmem:[%s1795_s21] sm:$0xff] }
  0x5a   : > { %582 = vperm.xlu1 %1533, %v544_v48   ;;  %622 = vperm.xlu2 %1534, %v552_v63  }
  0x5b   : > { %740 = vmatpush.bf16.msra.mxu1 %v1414_v14 }
  0x5c   : > { %493 = vmatpush.bf16.msra.mxu0 %v1915_v39  ;;  %1458 = vmatpush.bf16.msra.mxu3 %v1915_v39 }
  0x5d   : > { %838 = vmatpush.bf16.msra.mxu2 %v1405_v10 }
  0x5f   : > { %741 = vmatpush.bf16.msra.mxu1 %v1413_v17 }
  0x60   : > { %494 = vmatpush.bf16.msra.mxu0 %v1926_v43  ;;  %1459 = vmatpush.bf16.msra.mxu3 %v1926_v43 }
  0x61   : > { %632 = vperm.xlu0 %1532, %v554_v52   ;;  %839 = vmatpush.bf16.msra.mxu2 %v1404_v11 }
  0x62   : > { %587 = vperm.xlu1 %1533, %v545_v56   ;;  %627 = vperm.xlu2 %1534, %v553_v2  }
  0x63   : > { %742 = vmatpush.bf16.msra.mxu1 %v1412_v19 }
  0x64   : > { %495 = vmatpush.bf16.msra.mxu0 %v1937_v47  ;;  %1460 = vmatpush.bf16.msra.mxu3 %v1937_v47 }
  0x65   : > { %840 = vmatpush.bf16.msra.mxu2 %v1403_v13 }
  0x67   : > { %743 = vmatpush.bf16.msra.mxu1 %v1411_v21 }
  0x68   : > { %496 = vmatpush.bf16.msra.mxu0 %v1948_v51  ;;  %1461 = vmatpush.bf16.msra.mxu3 %v1948_v51 }
  0x69   : > { %597 = vperm.xlu0 %1532, %v547_v59   ;;  %841 = vmatpush.bf16.msra.mxu2 %v1402_v15 }
  0x6a   : > { %602 = vperm.xlu1 %1533, %v548_v61   ;;  %592 = vperm.xlu2 %1534, %v546_v3  }
  0x6b   : > { %744 = vmatpush.bf16.msra.mxu1 %v1410_v22 }
  0x6c   : > { %497 = vmatpush.bf16.msra.mxu0 %v1959_v55  ;;  %1462 = vmatpush.bf16.msra.mxu3 %v1959_v55 }
  0x6d   : > { %842 = vmatpush.bf16.msra.mxu2 %v1401_v18 }
  0x6f   : > { %498 = vmatmul.bf16.vlgmr.msra.gmra.mxu0 %v1392_v57  ;;  %528 = vmatmul.bf16.vlgmr.msra.gmra.mxu3 %v1398_v58 }
  0x70   : > { %1463 = vmatpush.bf16.msrb.mxu3 %v1415_v12  ;;  %745 = vmatpush.bf16.msra.mxu1 %v1409_v23 }
  0x71   : > { %612 = vperm.xlu0 %1532, %v550_v62   ;;  %843 = vmatpush.bf16.msra.mxu2 %v1400_v20 }
  0x72   : > { %607 = vperm.xlu2 %1534, %v549_v5  }
  0x74   : > { %1464 = vmatpush.bf16.msrb.mxu3 %v1414_v14  ;;  %844 = vmatmul.bf16.vlgmr.msra.gmra.mxu2 %v1959_v55 }
  0x75   : > { %746 = vmatpush.bf16.msra.mxu1 %v1408_v24 }
  0x78   : > { %1465 = vmatpush.bf16.msrb.mxu3 %v1413_v17 }
  0x7c   : > { %1466 = vmatpush.bf16.msrb.mxu3 %v1412_v19 }
  0x7f   : > { %503 = vmatmul.bf16.gmra.mxu0 %v1393_v0  ;;  %533 = vmatmul.bf16.gmra.mxu3 %v1399_v1 }
  0x80   : > { %1467 = vmatpush.bf16.msrb.mxu3 %v1411_v21 }
  0x84   : > { %1468 = vmatpush.bf16.msrb.mxu3 %v1410_v22  ;;  %849 = vmatmul.bf16.gmra.mxu2 %v1948_v51 }
  0x88   : > { %1469 = vmatpush.bf16.msrb.mxu3 %v1409_v23 }
  0x8c   : > { %1470 = vmatpush.bf16.msrb.mxu3 %v1408_v24 }
  0x8f   : > { %508 = vmatmul.bf16.gmra.mxu0 %v1394_v4 }
  0x90   : > { %1471 = vmatpush.bf16.msra.mxu3 %v1407_v7 }
  0x94   : > { %1472 = vmatpush.bf16.msra.mxu3 %v1406_v8  ;;  %854 = vmatmul.bf16.gmra.mxu2 %v1937_v47 }
  0x98   : > { %1473 = vmatpush.bf16.msra.mxu3 %v1405_v10 }
  0x9c   : > { %1474 = vmatpush.bf16.msra.mxu3 %v1404_v11 }
  0x9f   : > { %513 = vmatmul.bf16.gmra.mxu0 %v1395_v6 }
  0xa0   : > { %1475 = vmatpush.bf16.msra.mxu3 %v1403_v13 }
  0xa4   : > { %1476 = vmatpush.bf16.msra.mxu3 %v1402_v15  ;;  %859 = vmatmul.bf16.gmra.mxu2 %v1926_v43 }
  0xa8   : > { %1477 = vmatpush.bf16.msra.mxu3 %v1401_v18 }
  0xac   : > { %v618_v28 = vpop.permute.xlu2 %617  ;;  %1478 = vmatpush.bf16.msra.mxu3 %v1400_v20 }
  0xaf   : > { %518 = vmatmul.bf16.gmra.mxu0 %v1396_v9 }
  0xb4   : > { %v623_v40 = vpop.permute.xlu2 %622  ;;  %864 = vmatmul.bf16.gmra.mxu2 %v1915_v39 }
  0xbb   : > { %v558_v25 = vpop.permute.xlu0 %557 }
  0xbc   : > { %v568_v37 = vpop.permute.xlu1 %567  ;;  %v628_v53 = vpop.permute.xlu2 %627 }
  0xbf   : > { %523 = vmatmul.bf16.gmra.mxu0 %v1397_v16 }
  0xc3   : > { %v563_v30 = vpop.permute.xlu0 %562 }
  0xc4   : > { %v573_v48 = vpop.permute.xlu1 %572  ;;  %869 = vmatmul.bf16.gmra.mxu2 %v1904_v35  ;;  %v593_v1 = vpop.permute.xlu2 %592 }
  0xcb   : > { %v578_v46 = vpop.permute.xlu0 %577 }
  0xcc   : > { %v583_v59 = vpop.permute.xlu1 %582  ;;  %v608_v13 = vpop.permute.xlu2 %607 }
  0xd3   : > { %v633_v54 = vpop.permute.xlu0 %632 }
  0xd4   : > { %v588_v39 = vpop.permute.xlu1 %587 }
  0xdb   : > { %v598_v7 = vpop.permute.xlu0 %597 }
  0xdc   : > { %v603_v8 = vpop.permute.xlu1 %602 }
  0xec   : > { %v499_v26 = vpop.f32.mrf.mxu0 }
  0xed   : > { %v635_v33 = vmul.f32 %v558_v25, %v499_v26 }
  0xf2   : > { %v529_v29 = vpop.f32.mrf.mxu3 }
  0xf3   : > { %v647_v38 = vmul.f32 %v618_v28, %v529_v29 }
  0xf4   : > { %v501_v32 = vpop.f32.mrf.mxu0 }
  0xf5   : > { %v636_v34 = vmul.f32 %v563_v30, %v501_v32 }
  0xf7   : > { %v667_v36 = vpack.c.bf16 %v636_v34, %v635_v33  ;;  %v845_v18 = vpop.f32.mrf.mxu2 }
  0xf9   : > { %747 = vmatmul.bf16.vlgmr.msra.gmra.mxu1 %v667_v36 }
  0xfa   : > { %v531_v41 = vpop.f32.mrf.mxu3 }
  0xfb   : > { %v648_v42 = vmul.f32 %v623_v40, %v531_v41 }
  0xfc   : > { %v504_v44 = vpop.f32.mrf.mxu0 }
  0xfd   : > { %v673_v45 = vpack.c.bf16 %v648_v42, %v647_v38  ;;  %v637_v50 = vmul.f32 %v568_v37, %v504_v44 }
  0xff   : > { %777 = vmatmul.bf16.vlgmr.msrb.gmra.mxu3 %v673_v45  ;;  %v847_v19 = vpop.f32.mrf.mxu2 }
 0x102   : > { %v534_v47 = vpop.f32.mrf.mxu3 }
 0x103   : > { %v649_v43 = vmul.f32 %v628_v53, %v534_v47 }
 0x104   : > { %v506_v49 = vpop.f32.mrf.mxu0 }
 0x105   : > { %v638_v51 = vmul.f32 %v573_v48, %v506_v49 }
 0x107   : > { %v668_v52 = vpack.c.bf16 %v638_v51, %v637_v50  ;;  %v850_v20 = vpop.f32.mrf.mxu2 }
 0x109   : > { %752 = vmatmul.bf16.gmra.mxu1 %v668_v52 }
 0x10a   : > { %v536_v55 = vpop.f32.mrf.mxu3 }
 0x10b   : > { %v650_v56 = vmul.f32 %v633_v54, %v536_v55 }
 0x10c   : > { %v509_v57 = vpop.f32.mrf.mxu0 }
 0x10d   : > { %v674_v58 = vpack.c.bf16 %v650_v56, %v649_v43  ;;  %v639_v61 = vmul.f32 %v578_v46, %v509_v57 }
 0x10f   : > { %782 = vmatmul.bf16.gmra.mxu3 %v674_v58  ;;  %v852_v28 = vpop.f32.mrf.mxu2 }
 0x114   : > { %v511_v60 = vpop.f32.mrf.mxu0 }
 0x115   : > { %v640_v62 = vmul.f32 %v583_v59, %v511_v60 }
 0x117   : > { %v669_v63 = vpack.c.bf16 %v640_v62, %v639_v61  ;;  %v855_v38 = vpop.f32.mrf.mxu2 }
 0x119   : > { %757 = vmatmul.bf16.gmra.mxu1 %v669_v63 }
 0x11c   : > { %v514_v0 = vpop.f32.mrf.mxu0 }
 0x11d   : > { %v641_v3 = vmul.f32 %v588_v39, %v514_v0 }
 0x11f   : > { %874 = vmatmul.bf16.vlgmr.msra.gmra.mxu3 %v1893_v31  ;;  %v613_v31 = vpop.permute.xlu0 %612  ;;  %v857_v49 = vpop.f32.mrf.mxu2 }
 0x124   : > { %v516_v2 = vpop.f32.mrf.mxu0 }
 0x125   : > { %v642_v4 = vmul.f32 %v593_v1, %v516_v2 }
 0x127   : > { %v670_v5 = vpack.c.bf16 %v642_v4, %v641_v3  ;;  %v860_v56 = vpop.f32.mrf.mxu2 }
 0x129   : > { %762 = vmatmul.bf16.gmra.mxu1 %v670_v5 }
 0x12c   : > { %v519_v6 = vpop.f32.mrf.mxu0 }
 0x12d   : > { %v643_v10 = vmul.f32 %v598_v7, %v519_v6 }
 0x12f   : > { %879 = vmatmul.bf16.gmra.mxu3 %v1883_v27  ;;  %v2009_v27 = vld [vmem:[%s349_s18] ss:$0 sm:$0xff]  ;;  %v862_v2 = vpop.f32.mrf.mxu2 }
 0x134   : > { %v521_v9 = vpop.f32.mrf.mxu0 }
 0x135   : > { %v644_v35 = vmul.f32 %v603_v8, %v521_v9 }
 0x137   : > { %v671_v11 = vpack.c.bf16 %v644_v35, %v643_v10  ;;  %v865_v35 = vpop.f32.mrf.mxu2 }
 0x139   : > { %767 = vmatmul.bf16.gmra.mxu1 %v671_v11 }
 0x13c   : > { %v524_v12 = vpop.f32.mrf.mxu0 }
 0x13d   : > { %v645_v15 = vmul.f32 %v608_v13, %v524_v12 }
 0x144   : > { %v526_v14 = vpop.f32.mrf.mxu0 }
 0x145   : > { %v646_v16 = vmul.f32 %v613_v31, %v526_v14 }
 0x147   : > { %v672_v17 = vpack.c.bf16 %v646_v16, %v645_v15 }
 0x149   : > { %772 = vmatmul.bf16.gmra.mxu1 %v672_v17 }
 0x176   : > { %v748_v21 = vpop.f32.mrf.mxu1 }
 0x177   : > { %v846_v22 = vadd.f32 %v845_v18, %v748_v21  ;;  %v867_v18 = vpop.f32.mrf.mxu2 }
 0x179   : > { %v889_v23 = vadd.f32 %v2009_v27, %v846_v22 }
 0x17b   : > { %v2012_v24 = vmax.f32 %v889_v23, 0.0 }
 0x17d   : > { %v921_v25 = vmul.f32 %v2012_v24, %v2012_v24 }
 0x17e   : > { %v750_v26 = vpop.f32.mrf.mxu1 }
 0x17f   : > { %v848_v29 = vadd.f32 %v847_v19, %v750_v26  ;;  %937 = vadd.xlane.f32.xlu1 %v921_v25 }
 0x181   : > { %v890_v30 = vadd.f32 %v2009_v27, %v848_v29  ;;  %v870_v29 = vpop.f32.mrf.mxu2 }
 0x182   : > { %v778_v32 = vpop.f32.mrf.mxu3 }
 0x183   : > { %v2017_v33 = vmax.f32 %v890_v30, 0.0 }
 0x185   : > { %v922_v34 = vmul.f32 %v2017_v33, %v2017_v33 }
 0x186   : > { %v753_v36 = vpop.f32.mrf.mxu1 }
 0x187   : > { %v851_v37 = vadd.f32 %v850_v20, %v753_v36  ;;  %939 = vadd.xlane.f32.xlu2 %v922_v34 }
 0x189   : > { %v891_v40 = vadd.f32 %v2009_v27, %v851_v37 }
 0x18a   : > { %v2022_v41 = vpop.f32.mrf.mxu3 }
 0x18b   : > { %v2024_v42 = vmax.f32 %v891_v40, 0.0 }
 0x18d   : > { %v923_v44 = vmul.f32 %v2024_v42, %v2024_v42 }
 0x18e   : > { %v755_v45 = vpop.f32.mrf.mxu1 }
 0x18f   : > { %v853_v46 = vadd.f32 %v852_v28, %v755_v45  ;;  %941 = vadd.xlane.f32.xlu0 %v923_v44 }
 0x191   : > { %v892_v47 = vadd.f32 %v2009_v27, %v853_v46 }
 0x192   : > { %v2029_v48 = vpop.f32.mrf.mxu3 }
 0x193   : > { %v2031_v50 = vmax.f32 %v892_v47, 0.0 }
 0x195   : > { %v924_v51 = vmul.f32 %v2031_v50, %v2031_v50 }
 0x196   : > { %v758_v52 = vpop.f32.mrf.mxu1 }
 0x197   : > { %v856_v53 = vadd.f32 %v855_v38, %v758_v52  ;;  %943 = vadd.xlane.f32.xlu2 %v924_v51 }
 0x199   : > { %v893_v43 = vadd.f32 %v2009_v27, %v856_v53 }
 0x19a   : > { %v785_v54 = vpop.f32.mrf.mxu3 }
 0x19b   : > { %v2036_v55 = vmax.f32 %v893_v43, 0.0 }
 0x19d   : > { %v925_v57 = vmul.f32 %v2036_v55, %v2036_v55 }
 0x19e   : > { %v760_v58 = vpop.f32.mrf.mxu1 }
 0x19f   : > { %v858_v59 = vadd.f32 %v857_v49, %v760_v58  ;;  %945 = vadd.xlane.f32.xlu1 %v925_v57  ;;  %v872_v49 = vpop.f32.mrf.mxu2 }
 0x1a1   : > { %v894_v60 = vadd.f32 %v2009_v27, %v858_v59 }
 0x1a2   : > { %v875_v61 = vpop.f32.mrf.mxu3 }
 0x1a3   : > { %v2041_v62 = vmax.f32 %v894_v60, 0.0  ;;  %v876_v63 = vadd.f32 %v875_v61, %v778_v32 }
 0x1a5   : > { %v901_v0 = vadd.f32 %v2009_v27, %v876_v63  ;;  %v926_v39 = vmul.f32 %v2041_v62, %v2041_v62 }
 0x1a6   : > { %v763_v1 = vpop.f32.mrf.mxu1 }
 0x1a7   : > { %v2046_v3 = vmax.f32 %v901_v0, 0.0  ;;  %v861_v4 = vadd.f32 %v860_v56, %v763_v1  ;;  %947 = vadd.xlane.f32.xlu2 %v926_v39 }
 0x1a9   : > { %v895_v5 = vadd.f32 %v2009_v27, %v861_v4  ;;  %v933_v6 = vmul.f32 %v2046_v3, %v2046_v3 }
 0x1aa   : > { %v877_v7 = vpop.f32.mrf.mxu3 }
 0x1ab   : > { %961 = vadd.xlane.f32.xlu0 %v933_v6  ;;  %v2051_v8 = vmax.f32 %v895_v5, 0.0  ;;  %v878_v37 = vadd.f32 %v877_v7, %v2022_v41 }
 0x1ad   : > { %v927_v12 = vmul.f32 %v2051_v8, %v2051_v8  ;;  %v902_v45 = vadd.f32 %v2009_v27, %v878_v37 }
 0x1ae   : > { %v765_v9 = vpop.f32.mrf.mxu1 }
 0x1af   : > { %v863_v10 = vadd.f32 %v862_v2, %v765_v9  ;;  %v2082_v41 = vmax.f32 %v902_v45, 0.0 }
 0x1b1   : > { %v896_v11 = vadd.f32 %v2009_v27, %v863_v10  ;;  %v934_v57 = vmul.f32 %v2082_v41, %v2082_v41 }
 0x1b2   : > { %v880_v13 = vpop.f32.mrf.mxu3 }
 0x1b3   : > { %v2056_v31 = vmax.f32 %v896_v11, 0.0  ;;  %949 = vadd.xlane.f32.xlu0 %v927_v12  ;;  %v881_v53 = vadd.f32 %v880_v13, %v2029_v48 }
 0x1b5   : > { %v928_v14 = vmul.f32 %v2056_v31, %v2056_v31  ;;  %v903_v56 = vadd.f32 %v2009_v27, %v881_v53 }
 0x1b6   : > { %v768_v15 = vpop.f32.mrf.mxu1 }
 0x1b7   : > { %v866_v16 = vadd.f32 %v865_v35, %v768_v15  ;;  %951 = vadd.xlane.f32.xlu1 %v928_v14  ;;  %v2093_v59 = vmax.f32 %v903_v56, 0.0 }
 0x1b9   : > { %v897_v17 = vadd.f32 %v2009_v27, %v866_v16  ;;  %v935_v60 = vmul.f32 %v2093_v59, %v2093_v59 }
 0x1ba   : > { %v882_v21 = vpop.f32.mrf.mxu3 }
 0x1bb   : > { %v2061_v19 = vmax.f32 %v897_v17, 0.0  ;;  %v883_v25 = vadd.f32 %v882_v21, %v785_v54 }
 0x1bd   : > { %v929_v20 = vmul.f32 %v2061_v19, %v2061_v19  ;;  %v904_v30 = vadd.f32 %v2009_v27, %v883_v25 }
 0x1be   : > { %v770_v22 = vpop.f32.mrf.mxu1 }
 0x1bf   : > { %v868_v23 = vadd.f32 %v867_v18, %v770_v22  ;;  %953 = vadd.xlane.f32.xlu2 %v929_v20  ;;  %v2072_v38 = vmax.f32 %v904_v30, 0.0 }
 0x1c1   : > { %v898_v26 = vadd.f32 %v2009_v27, %v868_v23  ;;  %v936_v46 = vmul.f32 %v2072_v38, %v2072_v38 }
 0x1c3   : > { %v2066_v28 = vmax.f32 %v898_v26, 0.0 }
 0x1c5   : > { %v930_v32 = vmul.f32 %v2066_v28, %v2066_v28 }
 0x1c6   : > { %v773_v34 = vpop.f32.mrf.mxu1 }
 0x1c7   : > { %v871_v36 = vadd.f32 %v870_v29, %v773_v34  ;;  %955 = vadd.xlane.f32.xlu0 %v930_v32 }
 0x1c9   : > { %v899_v40 = vadd.f32 %v2009_v27, %v871_v36 }
 0x1cb   : > { %v2075_v44 = vmax.f32 %v899_v40, 0.0 }
 0x1cd   : > { %v931_v47 = vmul.f32 %v2075_v44, %v2075_v44 }
 0x1ce   : > { %v775_v51 = vpop.f32.mrf.mxu1 }
 0x1cf   : > { %v873_v52 = vadd.f32 %v872_v49, %v775_v51  ;;  %967 = vadd.xlane.f32.xlu0 %v936_v46  ;;  %957 = vadd.xlane.f32.xlu1 %v931_v47 }
 0x1d1   : > { %v900_v43 = vadd.f32 %v2009_v27, %v873_v52 }
 0x1d3   : > { %v2086_v54 = vmax.f32 %v900_v43, 0.0 }
 0x1d5   : > { %v932_v58 = vmul.f32 %v2086_v54, %v2086_v54 }
 0x1d7   : > { %963 = vadd.xlane.f32.xlu1 %v934_v57  ;;  %959 = vadd.xlane.f32.xlu2 %v932_v58 }
 0x1df   : > { %965 = vadd.xlane.f32.xlu2 %v935_v60 }
 0x1f2   : > { %v938_v48 = vpop.xlane.xlu1 %937 }
 0x1f3   : > { %v969_v61 = vmax.f32 %v938_v48, 1e-24 }
 0x1f5   : > { %1536 = vrsqrt.f32 %v969_v61  ;;  %vm991_vm1 = vweird.f32 %v969_v61 }
 0x1fa   : > { %v940_v63 = vpop.xlane.xlu2 %939 }
 0x1fb   : > { %v1537_v0 = vpop.eup %1536  ;;  %v970_v27 = vmax.f32 %v940_v63, 1e-24 }
 0x1fc   : > { %v986_v39 = vmul.f32 %v1537_v0, %v969_v61  ;;  %vm992_vm0 = vweird.f32 %v1537_v0 }
 0x1fd   : > { %1538 = vrsqrt.f32 %v970_v27  ;;  %vm993_vm2 = vmor %vm991_vm1, %vm992_vm0  ;;  %vm1001_vm4 = vweird.f32 %v970_v27 }
 0x1fe   : > { %v987_v1 = vmul.f32 %v1537_v0, %v986_v39 }
 0x200   : > { %v988_v2 = vmul.f32 0.5, %v987_v1 }
 0x202   : > { %v989_v4 = vsub.f32 1.5, %v988_v2  ;;  %v942_v5 = vpop.xlane.xlu0 %941 }
 0x203   : > { %v1539_v6 = vpop.eup %1538  ;;  %v971_v7 = vmax.f32 %v942_v5, 1e-24 }
 0x204   : > { %v990_v9 = vmul.f32 %v1537_v0, %v989_v4  ;;  %v996_v10 = vmul.f32 %v1539_v6, %v970_v27  ;;  %vm1002_vm3 = vweird.f32 %v1539_v6 }
 0x205   : > { %1540 = vrsqrt.f32 %v971_v7  ;;  %vm1003_vm5 = vmor %vm1001_vm4, %vm1002_vm3  ;;  %vm1011_vm7 = vweird.f32 %v971_v7 }
 0x206   : > { %v994_v35 = vsel %vm993_vm2, %v1537_v0, %v990_v9  ;;  %v997_v11 = vmul.f32 %v1539_v6, %v996_v10 }
 0x207   : > { %v1145_v12 = vmul.f32 %v994_v35, %v2012_v24 }
 0x208   : > { %v998_v13 = vmul.f32 0.5, %v997_v11 }
 0x209   : > { %1161 = vst [vmem:[%s2180_s6] sm:$0xff] %v1145_v12 }
 0x20a   : > { %v999_v14 = vsub.f32 1.5, %v998_v13  ;;  %v944_v15 = vpop.xlane.xlu2 %943 }
 0x20b   : > { %v1541_v16 = vpop.eup %1540  ;;  %v972_v17 = vmax.f32 %v944_v15, 1e-24 }
 0x20c   : > { %v1000_v18 = vmul.f32 %v1539_v6, %v999_v14  ;;  %v1006_v20 = vmul.f32 %v1541_v16, %v971_v7  ;;  %vm1012_vm6 = vweird.f32 %v1541_v16 }
 0x20d   : > { %1542 = vrsqrt.f32 %v972_v17  ;;  %vm1013_vm8 = vmor %vm1011_vm7, %vm1012_vm6  ;;  %vm1021_vm10 = vweird.f32 %v972_v17 }
 0x20e   : > { %v1004_v21 = vsel %vm1003_vm5, %v1539_v6, %v1000_v18  ;;  %v1007_v22 = vmul.f32 %v1541_v16, %v1006_v20 }
 0x20f   : > { %v1146_v23 = vmul.f32 %v1004_v21, %v2017_v33 }
 0x210   : > { %v1008_v24 = vmul.f32 0.5, %v1007_v22 }
 0x211   : > { %1162 = vst [vmem:[%s2180_s6 + $0x8] sm:$0xff] %v1146_v23 }
 0x212   : > { %v1009_v25 = vsub.f32 1.5, %v1008_v24  ;;  %v946_v26 = vpop.xlane.xlu1 %945 }
 0x213   : > { %v1543_v29 = vpop.eup %1542  ;;  %v973_v30 = vmax.f32 %v946_v26, 1e-24 }
 0x214   : > { %v1010_v32 = vmul.f32 %v1541_v16, %v1009_v25  ;;  %v1016_v34 = vmul.f32 %v1543_v29, %v972_v17  ;;  %vm1022_vm9 = vweird.f32 %v1543_v29 }
 0x215   : > { %1544 = vrsqrt.f32 %v973_v30  ;;  %vm1023_vm11 = vmor %vm1021_vm10, %vm1022_vm9  ;;  %vm1031_vm13 = vweird.f32 %v973_v30 }
 0x216   : > { %v1014_v36 = vsel %vm1013_vm8, %v1541_v16, %v1010_v32  ;;  %v1017_v37 = vmul.f32 %v1543_v29, %v1016_v34 }
 0x217   : > { %v1147_v40 = vmul.f32 %v1014_v36, %v2024_v42 }
 0x218   : > { %v1018_v33 = vmul.f32 0.5, %v1017_v37 }
 0x219   : > { %1163 = vst [vmem:[%s2180_s6 + $0x10] sm:$0xff] %v1147_v40 }
 0x21a   : > { %v1019_v45 = vsub.f32 1.5, %v1018_v33  ;;  %v948_v46 = vpop.xlane.xlu2 %947 }
 0x21b   : > { %v1545_v47 = vpop.eup %1544  ;;  %v974_v49 = vmax.f32 %v948_v46, 1e-24 }
 0x21c   : > { %v1020_v51 = vmul.f32 %v1543_v29, %v1019_v45  ;;  %v1026_v52 = vmul.f32 %v1545_v47, %v973_v30  ;;  %vm1032_vm12 = vweird.f32 %v1545_v47 }
 0x21d   : > { %1546 = vrsqrt.f32 %v974_v49  ;;  %vm1033_vm14 = vmor %vm1031_vm13, %vm1032_vm12  ;;  %vm1041_vm0 = vweird.f32 %v974_v49 }
 0x21e   : > { %v1024_v53 = vsel %vm1023_vm11, %v1543_v29, %v1020_v51  ;;  %v1027_v43 = vmul.f32 %v1545_v47, %v1026_v52  ;;  %v962_v56 = vpop.xlane.xlu0 %961 }
 0x21f   : > { %v1148_v42 = vmul.f32 %v1024_v53, %v2031_v50  ;;  %v981_v57 = vmax.f32 %v962_v56, 1e-24 }
 0x220   : > { %v1028_v58 = vmul.f32 0.5, %v1027_v43 }
 0x221   : > { %1164 = vst [vmem:[%s2180_s6 + $0x18] sm:$0xff] %v1148_v42  ;;  %1548 = vrsqrt.f32 %v981_v57  ;;  %vm1111_vm3 = vweird.f32 %v981_v57 }
 0x222   : > { %v1029_v60 = vsub.f32 1.5, %v1028_v58 }
 0x223   : > { %v1547_v48 = vpop.eup %1546 }
 0x224   : > { %v1030_v61 = vmul.f32 %v1545_v47, %v1029_v60  ;;  %v1036_v63 = vmul.f32 %v1547_v48, %v974_v49  ;;  %vm1042_vm15 = vweird.f32 %v1547_v48 }
 0x225   : > { %vm1043_vm1 = vmor %vm1041_vm0, %vm1042_vm15 }
 0x226   : > { %v1034_v0 = vsel %vm1033_vm14, %v1545_v47, %v1030_v61  ;;  %v1037_v27 = vmul.f32 %v1547_v48, %v1036_v63  ;;  %v950_v39 = vpop.xlane.xlu0 %949 }
 0x227   : > { %v1549_v1 = vpop.eup %1548  ;;  %v1149_v50 = vmul.f32 %v1034_v0, %v2036_v55  ;;  %v975_v2 = vmax.f32 %v950_v39, 1e-24 }
 0x228   : > { %v1038_v4 = vmul.f32 0.5, %v1037_v27  ;;  %v1106_v5 = vmul.f32 %v1549_v1, %v981_v57  ;;  %vm1112_vm2 = vweird.f32 %v1549_v1 }
 0x229   : > { %1165 = vst [vmem:[%s2180_s6 + $0x20] sm:$0xff] %v1149_v50  ;;  %1550 = vrsqrt.f32 %v975_v2  ;;  %vm1113_vm4 = vmor %vm1111_vm3, %vm1112_vm2  ;;  %vm1051_vm6 = vweird.f32 %v975_v2 }
 0x22a   : > { %v1039_v6 = vsub.f32 1.5, %v1038_v4  ;;  %v1107_v7 = vmul.f32 %v1549_v1, %v1106_v5  ;;  %v952_v9 = vpop.xlane.xlu1 %951 }
 0x22b   : > { %v976_v10 = vmax.f32 %v952_v9, 1e-24 }
 0x22c   : > { %v1040_v35 = vmul.f32 %v1547_v48, %v1039_v6  ;;  %v1108_v11 = vmul.f32 0.5, %v1107_v7 }
 0x22d   : > { %1552 = vrsqrt.f32 %v976_v10  ;;  %vm1061_vm9 = vweird.f32 %v976_v10 }
 0x22e   : > { %v1044_v12 = vsel %vm1043_vm1, %v1547_v48, %v1040_v35  ;;  %v1109_v55 = vsub.f32 1.5, %v1108_v11 }
 0x22f   : > { %v1551_v13 = vpop.eup %1550  ;;  %v1150_v14 = vmul.f32 %v1044_v12, %v2041_v62 }
 0x230   : > { %v1110_v15 = vmul.f32 %v1549_v1, %v1109_v55  ;;  %v1046_v16 = vmul.f32 %v1551_v13, %v975_v2  ;;  %vm1052_vm5 = vweird.f32 %v1551_v13 }
 0x231   : > { %1166 = vst [vmem:[%s2180_s6 + $0x28] sm:$0xff] %v1150_v14  ;;  %vm1053_vm7 = vmor %vm1051_vm6, %vm1052_vm5 }
 0x232   : > { %v1114_v17 = vsel %vm1113_vm4, %v1549_v1, %v1110_v15  ;;  %v1047_v18 = vmul.f32 %v1551_v13, %v1046_v16  ;;  %v954_v20 = vpop.xlane.xlu2 %953 }
 0x233   : > { %v1553_v21 = vpop.eup %1552  ;;  %v1157_v22 = vmul.f32 %v1114_v17, %v2046_v3  ;;  %v977_v23 = vmax.f32 %v954_v20, 1e-24 }
 0x234   : > { %v1048_v24 = vmul.f32 0.5, %v1047_v18  ;;  %v1056_v25 = vmul.f32 %v1553_v21, %v976_v10  ;;  %vm1062_vm8 = vweird.f32 %v1553_v21 }
 0x235   : > { %1173 = vst [vmem:[%s2180_s6 + $0x60] sm:$0xff] %v1157_v22  ;;  %1554 = vrsqrt.f32 %v977_v23  ;;  %vm1063_vm10 = vmor %vm1061_vm9, %vm1062_vm8  ;;  %vm1071_vm12 = vweird.f32 %v977_v23 }
 0x236   : > { %v1049_v62 = vsub.f32 1.5, %v1048_v24  ;;  %v1057_v26 = vmul.f32 %v1553_v21, %v1056_v25 }
 0x238   : > { %v1050_v29 = vmul.f32 %v1551_v13, %v1049_v62  ;;  %v1058_v30 = vmul.f32 0.5, %v1057_v26 }
 0x23a   : > { %v1054_v32 = vsel %vm1053_vm7, %v1551_v13, %v1050_v29  ;;  %v1059_v34 = vsub.f32 1.5, %v1058_v30  ;;  %v956_v36 = vpop.xlane.xlu0 %955 }
 0x23b   : > { %v1555_v3 = vpop.eup %1554  ;;  %v1151_v37 = vmul.f32 %v1054_v32, %v2051_v8  ;;  %v978_v40 = vmax.f32 %v956_v36, 1e-24 }
 0x23c   : > { %v1060_v33 = vmul.f32 %v1553_v21, %v1059_v34  ;;  %v1066_v45 = vmul.f32 %v1555_v3, %v977_v23  ;;  %vm1072_vm11 = vweird.f32 %v1555_v3 }
 0x23d   : > { %1167 = vst [vmem:[%s2180_s6 + $0x30] sm:$0xff] %v1151_v37  ;;  %1556 = vrsqrt.f32 %v978_v40  ;;  %vm1073_vm13 = vmor %vm1071_vm12, %vm1072_vm11  ;;  %vm1081_vm15 = vweird.f32 %v978_v40 }
 0x23e   : > { %v1064_v46 = vsel %vm1063_vm10, %v1553_v21, %v1060_v33  ;;  %v1067_v47 = vmul.f32 %v1555_v3, %v1066_v45 }
 0x23f   : > { %v1152_v49 = vmul.f32 %v1064_v46, %v2056_v31 }
 0x240   : > { %v1068_v51 = vmul.f32 0.5, %v1067_v47 }
 0x241   : > { %1168 = vst [vmem:[%s2180_s6 + $0x38] sm:$0xff] %v1152_v49 }
 0x242   : > { %v1069_v8 = vsub.f32 1.5, %v1068_v51  ;;  %v968_v52 = vpop.xlane.xlu0 %967  ;;  %v958_v53 = vpop.xlane.xlu1 %957 }
 0x243   : > { %v1557_v43 = vpop.eup %1556  ;;  %v984_v56 = vmax.f32 %v968_v52, 1e-24  ;;  %v979_v42 = vmax.f32 %v958_v53, 1e-24 }
 0x244   : > { %v1070_v57 = vmul.f32 %v1555_v3, %v1069_v8  ;;  %v1076_v58 = vmul.f32 %v1557_v43, %v978_v40  ;;  %vm1082_vm14 = vweird.f32 %v1557_v43 }
 0x245   : > { %1558 = vrsqrt.f32 %v984_v56  ;;  %vm1083_vm0 = vmor %vm1081_vm15, %vm1082_vm14  ;;  %vm1141_vm3 = vweird.f32 %v984_v56  ;;  %vm1091_vm5 = vweird.f32 %v979_v42 }
 0x246   : > { %v1074_v60 = vsel %vm1073_vm13, %v1555_v3, %v1070_v57  ;;  %v1077_v48 = vmul.f32 %v1557_v43, %v1076_v58  ;;  %1560 = vrsqrt.f32 %v979_v42 }
 0x247   : > { %v1153_v31 = vmul.f32 %v1074_v60, %v2061_v19 }
 0x248   : > { %v1078_v61 = vmul.f32 0.5, %v1077_v48 }
 0x249   : > { %1169 = vst [vmem:[%s2180_s6 + $0x40] sm:$0xff] %v1153_v31 }
 0x24a   : > { %v1079_v63 = vsub.f32 1.5, %v1078_v61  ;;  %v964_v0 = vpop.xlane.xlu1 %963  ;;  %v960_v27 = vpop.xlane.xlu2 %959 }
 0x24b   : > { %v1559_v39 = vpop.eup %1558  ;;  %v982_v1 = vmax.f32 %v964_v0, 1e-24  ;;  %v980_v50 = vmax.f32 %v960_v27, 1e-24 }
 0x24c   : > { %v1561_v2 = vpop.eup %1560  ;;  %v1080_v4 = vmul.f32 %v1557_v43, %v1079_v63  ;;  %v1136_v5 = vmul.f32 %v1559_v39, %v984_v56  ;;  %vm1142_vm1 = vweird.f32 %v1559_v39 }
 0x24d   : > { %v1086_v6 = vmul.f32 %v1561_v2, %v979_v42  ;;  %1562 = vrsqrt.f32 %v982_v1  ;;  %vm1092_vm2 = vweird.f32 %v1561_v2  ;;  %vm1143_vm4 = vmor %vm1141_vm3, %vm1142_vm1  ;;  %vm1121_vm9 = vweird.f32 %v982_v1 }
 0x24e   : > { %v1084_v19 = vsel %vm1083_vm0, %v1557_v43, %v1080_v4  ;;  %v1137_v7 = vmul.f32 %v1559_v39, %v1136_v5  ;;  %1564 = vrsqrt.f32 %v980_v50  ;;  %vm1093_vm6 = vmor %vm1091_vm5, %vm1092_vm2  ;;  %vm1101_vm11 = vweird.f32 %v980_v50 }
 0x24f   : > { %v1154_v9 = vmul.f32 %v1084_v19, %v2066_v28  ;;  %v1087_v10 = vmul.f32 %v1561_v2, %v1086_v6 }
 0x250   : > { %v1138_v35 = vmul.f32 0.5, %v1137_v7 }
 0x251   : > { %1170 = vst [vmem:[%s2180_s6 + $0x48] sm:$0xff] %v1154_v9  ;;  %v1088_v11 = vmul.f32 0.5, %v1087_v10 }
 0x252   : > { %v1139_v12 = vsub.f32 1.5, %v1138_v35  ;;  %v966_v55 = vpop.xlane.xlu2 %965 }
 0x253   : > { %v1563_v13 = vpop.eup %1562  ;;  %v1089_v14 = vsub.f32 1.5, %v1088_v11  ;;  %v983_v15 = vmax.f32 %v966_v55, 1e-24 }
 0x254   : > { %v1565_v16 = vpop.eup %1564  ;;  %v1140_v17 = vmul.f32 %v1559_v39, %v1139_v12  ;;  %v1116_v18 = vmul.f32 %v1563_v13, %v982_v1  ;;  %vm1122_vm7 = vweird.f32 %v1563_v13 }
 0x255   : > { %v1090_v28 = vmul.f32 %v1561_v2, %v1089_v14  ;;  %v1096_v20 = vmul.f32 %v1565_v16, %v980_v50  ;;  %1566 = vrsqrt.f32 %v983_v15  ;;  %vm1102_vm8 = vweird.f32 %v1565_v16  ;;  %vm1123_vm10 = vmor %vm1121_vm9, %vm1122_vm7 }
 0x256   : > { %v1144_v21 = vsel %vm1143_vm4, %v1559_v39, %v1140_v17  ;;  %v1117_v22 = vmul.f32 %v1563_v13, %v1116_v18  ;;  %vm1103_vm12 = vmor %vm1101_vm11, %vm1102_vm8  ;;  %vm1131_vm14 = vweird.f32 %v983_v15 }
 0x257   : > { %v1160_v23 = vmul.f32 %v1144_v21, %v2072_v38  ;;  %v1094_v24 = vsel %vm1093_vm6, %v1561_v2, %v1090_v28  ;;  %v1097_v25 = vmul.f32 %v1565_v16, %v1096_v20 }
 0x258   : > { %v1155_v62 = vmul.f32 %v1094_v24, %v2075_v44  ;;  %v1118_v26 = vmul.f32 0.5, %v1117_v22 }
 0x259   : > { %1176 = vst [vmem:[%s2180_s6 + $0x78] sm:$0xff] %v1160_v23  ;;  %v1098_v29 = vmul.f32 0.5, %v1097_v25 }
 0x25a   : > { %1171 = vst [vmem:[%s2180_s6 + $0x50] sm:$0xff] %v1155_v62  ;;  %v1119_v30 = vsub.f32 1.5, %v1118_v26 }
 0x25b   : > { %v1567_v32 = vpop.eup %1566  ;;  %v1099_v34 = vsub.f32 1.5, %v1098_v29 }
 0x25c   : > { %v1120_v38 = vmul.f32 %v1563_v13, %v1119_v30  ;;  %v1126_v36 = vmul.f32 %v1567_v32, %v983_v15  ;;  %vm1132_vm13 = vweird.f32 %v1567_v32 }
 0x25d   : > { %v1100_v44 = vmul.f32 %v1565_v16, %v1099_v34  ;;  %vm1133_vm15 = vmor %vm1131_vm14, %vm1132_vm13 }
 0x25e   : > { %v1124_v3 = vsel %vm1123_vm10, %v1563_v13, %v1120_v38  ;;  %v1127_v37 = vmul.f32 %v1567_v32, %v1126_v36 }
 0x25f   : > { %v1158_v40 = vmul.f32 %v1124_v3, %v2082_v41  ;;  %v1104_v33 = vsel %vm1103_vm12, %v1565_v16, %v1100_v44 }
 0x260   : > { %v1156_v45 = vmul.f32 %v1104_v33, %v2086_v54  ;;  %v1128_v46 = vmul.f32 0.5, %v1127_v37 }
 0x261   : > { %1174 = vst [vmem:[%s2180_s6 + $0x68] sm:$0xff] %v1158_v40 }
 0x262   : > { %1172 = vst [vmem:[%s2180_s6 + $0x58] sm:$0xff] %v1156_v45  ;;  %v1129_v47 = vsub.f32 1.5, %v1128_v46 }
 0x264   : > { %v1130_v49 = vmul.f32 %v1567_v32, %v1129_v47 }
 0x266   : > { %v1134_v51 = vsel %vm1133_vm15, %v1567_v32, %v1130_v49 }
 0x267   : > { %v1159_v41 = vmul.f32 %v1134_v51, %v2093_v59 }
 0x269   : > { %1175 = vst [vmem:[%s2180_s6 + $0x70] sm:$0xff] %v1159_v41 }
 0x26a PF: > { %p17_p1 = scmp.ge.s32.totalorder %s1751_s9, 5   ;;  %s2184_s21 = smov %s1658_s22 }
 0x26b   : > { %s2185_s22 = smov %s1662_s23  ;;  %s2186_s23 = smov %s1764_s14 }
 0x26c   : > { %s2187_s24 = smov %s1751_s9  ;;  %19 = sbr.rel (!%p17_p1) target bundleno = 4 (0x4), region = 101 }
 0x271   :  { %1188 = vsyncpa [#allocation3], 1 }
 0x272   :  { %1190 = vsyncpa [#allocation3 + $0x1], 1 }
 0x273   :  { %1191 = vsyncpa [#allocation5], 1 }
 0x274   :  { %1193 = vsyncpa [#allocation5 + $0x1], 1 }

</bundles_post_ra>
